<compile_context>
chip_gen: v6e
topology: v6e:2x2x1
jax: 0.10.0
libtpu: 0.0.40
codegen_flags: <defaults>
</compile_context>

<pallas_src>
import functools
from math import floor

import numpy as np
import jax
import jax.numpy as jnp
from jax.experimental import pallas as pl
from jax.experimental.pallas import tpu as pltpu

# -----------------------------------------------------------------------------
# Config (mirrors KmerFreqCNN.__init__ hyper-parameters, at small sizes)
# -----------------------------------------------------------------------------
IN_SIZE = 16
NUM_CONVS = 2
NUM_FCS = 2
FC_SIZE = 32
CONV_FEATURES = 8
POOL_SIZE = 2
FILTER_SIZE = 3
DILATION = 1
PADDING = 0
STRIDE = 1
BATCH = 2

TB = 128        # batch tile (sublane/M axis); sweep 512..2048 at large batch
LANE = 128      # lane tile width

# layer kinds
_CONV, _FC_RELU, _FC_SIG = 0, 1, 2


def _out_len(length, pad, dil, k, s):
    # utils.output_size (1-D): standard conv / pool output-length formula
    return floor((length + 2 * pad - dil * (k - 1) - 1) / s + 1)


def compute_fc_sizes():
    h = IN_SIZE
    for _ in range(NUM_CONVS):
        h = _out_len(h, PADDING, DILATION, FILTER_SIZE, STRIDE)
        h = _out_len(h, PADDING, DILATION, POOL_SIZE, POOL_SIZE)
    fc_input = h * CONV_FEATURES
    sizes = [fc_input]
    sizes.extend([FC_SIZE if i == 0 else int(FC_SIZE / (2 * i))
                  for i in range(NUM_FCS - 1)])
    sizes.append(1)
    return sizes, h  # h == final pooled length Lf


def _round_up(x, m):
    return ((x + m - 1) // m) * m


# -----------------------------------------------------------------------------
# Pallas kernel: full forward pass for one (tb, L0) batch tile.
# Layout: batch on sublanes (matmul M), features on lanes; every layer is one
# (tb, K) @ (K, N) MXU matmul whose weight matrix was pre-assembled at init.
# -----------------------------------------------------------------------------
def kmer_cnn_kernel(x_ref, p_ref, out_ref, *, layers, pool, op_dtype):
    # x_ref: (tb, L0) input block (rows = samples)
    # p_ref: (R, 256) packed weights/biases, VMEM-resident (constant index_map)
    # out_ref: (tb, 8) padded output block; column 0 is the sigmoid output
    h = x_ref[...].astype(op_dtype)                         # (tb, L0)
    result = None
    for (kind, wrow, krows, ncols, phase_w, brow, bcols) in layers:
        w = p_ref[wrow:wrow + krows, :ncols].astype(op_dtype)     # (K, N)
        z = jnp.dot(h[:, :krows], w,                              # one MXU matmul
                    preferred_element_type=jnp.float32)           # (tb, N) f32
        b = p_ref[brow:brow + 1, :bcols]                          # (1, bcols) f32
        if kind == _CONV:
            # Pool phases are 128-lane-aligned column groups of the same matmul;
            # relu(max(z_even, z_odd) + b) == max_j relu(z_j + b) (shared bias).
            # Matches PyTorch max_pool1d with ceil_mode=False (trailing pos dropped).
            m = z[:, :phase_w]
            for j in range(1, pool):
                m = jnp.maximum(m, z[:, j * phase_w:(j + 1) * phase_w])
            a = jnp.maximum(m + b, 0.0)                           # (tb, phase_w) f32
        elif kind == _FC_RELU:
            a = jnp.maximum(z + b, 0.0)
        else:  # _FC_SIG
            a = jax.nn.sigmoid(z + b)
        result = a
        h = a.astype(op_dtype)
    out_ref[...] = result                                         # (tb, 8)


# -----------------------------------------------------------------------------
# One-time parameter packing (init-time, numpy): fold im2col + pooling phases +
# the torch channel-major flatten into per-layer weight matrices, all placed in
# a single (rows, 256) f32 buffer -> one input DMA, resident across grid steps.
# -----------------------------------------------------------------------------
def pack_params(params):
    # TODO(synk): packing assumes the configured stride=1, dilation=1, padding=0;
    # other configs would need a generalized im2col index map here.
    assert STRIDE == 1 and DILATION == 1 and PADDING == 0, \
        "pack_params only supports stride=1, dilation=1, padding=0"

    blocks, layers = [], []
    off = 0

    def place(arr2d):
        nonlocal off
        r = off
        blocks.append((r, arr2d))
        off += _round_up(arr2d.shape[0], 8)   # keep every block sublane-aligned
        return r

    cin, lin = 1, IN_SIZE
    for (w, b) in params['convs']:                       # w: (Cout, Cin, K)
        w = np.asarray(w, np.float32)
        b = np.asarray(b, np.float32)
        cout, _, kk = w.shape
        lconv = lin - kk + 1
        lp = (lconv - POOL_SIZE) // POOL_SIZE + 1        # floor mode (ceil_mode=False)
        krows = lin * cin
        nvalid = lp * cout
        phase_w = _round_up(nvalid, LANE)                # lane-tile-aligned phase width
        wc = np.zeros((krows, POOL_SIZE * phase_w), np.float32)
        for j in range(POOL_SIZE):                       # pool phase
            for p in range(lp):                          # pooled output position
                for k in range(kk):                      # conv tap
                    pin = p * POOL_SIZE + j + k          # input position
                    for c in range(cin):
                        wc[pin * cin + c,
                           j * phase_w + p * cout: j * phase_w + (p + 1) * cout] = w[:, c, k]
        bv = np.zeros((1, phase_w), np.float32)
        for p in range(lp):
            bv[0, p * cout:(p + 1) * cout] = b
        wrow = place(wc)
        brow = place(bv)
        layers.append((_CONV, wrow, krows, POOL_SIZE * phase_w, phase_w, brow, phase_w))
        cin, lin = cout, lp

    lf, C = lin, cin                                     # final pooled length / channels

    fcs = params['fcs']
    for i, (w, b) in enumerate(fcs):
        w = np.asarray(w, np.float32)                    # (Fout, Fin)
        b = np.asarray(b, np.float32)
        fout, fin = w.shape
        last = (i == len(fcs) - 1)
        if i == 0:
            # absorb torch .view(batch, C*Lf) channel-major flatten:
            # kernel lane for (c, p) is p*C + c; torch feature index is c*Lf + p.
            assert fin == lf * C
            krows = lf * C
            m = np.zeros((krows, fout), np.float32)
            for p in range(lf):
                for c in range(C):
                    m[p * C + c, :] = w[:, c * lf + p]
        else:
            krows = fin
            m = np.ascontiguousarray(w.T)                # (Fin, Fout)
        ncols = 8 if last else fout                      # pad final output to 8 lanes
        if ncols != fout:
            m = np.pad(m, ((0, 0), (0, ncols - fout)))
        bv = np.zeros((1, ncols), np.float32)
        bv[0, :fout] = b
        wrow = place(m)
        brow = place(bv)
        layers.append((_FC_SIG if last else _FC_RELU, wrow, krows, ncols, 0, brow, ncols))

    rows = _round_up(off, 8)
    cols = _round_up(max(blk.shape[1] for _, blk in blocks), LANE)
    buf = np.zeros((rows, cols), np.float32)
    for r, blk in blocks:
        buf[r:r + blk.shape[0], :blk.shape[1]] = blk
    return jnp.asarray(buf), tuple(layers)


# -----------------------------------------------------------------------------
# Jitted wrapper: pad batch to a tile multiple, one pallas_call, slice column 0.
# -----------------------------------------------------------------------------
def _forward_impl(kmers, pbuf, *, layers, tb, op_dtype, pool):
    B, L0 = kmers.shape
    n_tiles = pl.cdiv(B, tb)
    B_pad = n_tiles * tb
    x = kmers.astype(jnp.float32)
    if B_pad != B:
        x = jnp.pad(x, ((0, B_pad - B), (0, 0)))
    rows, cols = pbuf.shape

    kernel = functools.partial(kmer_cnn_kernel, layers=layers, pool=pool,
                               op_dtype=op_dtype)
    out = pl.pallas_call(
        kernel,
        out_shape=jax.ShapeDtypeStruct((B_pad, 8), jnp.float32),
        grid=(n_tiles,),
        in_specs=[
            pl.BlockSpec((tb, L0), lambda i: (i, 0)),     # per-batch-tile input, natural layout
            pl.BlockSpec((rows, cols), lambda i: (0, 0)), # packed params, VMEM-resident
        ],
        out_specs=pl.BlockSpec((tb, 8), lambda i: (i, 0)),
        compiler_params=pltpu.CompilerParams(
            dimension_semantics=("parallel",)),           # megacore-shardable over batch tiles
    )(x, pbuf)
    return out[:B, :1]                                    # (B, 1), like torch


def build_forward(params, tb=TB, op_dtype=jnp.bfloat16):
    """Pack params ONCE and return (jitted forward fn, packed param buffer)."""
    pbuf, layers = pack_params(params)
    fwd = jax.jit(functools.partial(_forward_impl, layers=layers, tb=tb,
                                    op_dtype=op_dtype, pool=POOL_SIZE))
    return fwd, pbuf


# -----------------------------------------------------------------------------
# Deterministic parameter init + pure-JAX reference (PyTorch NCW semantics)
# -----------------------------------------------------------------------------
def init_params(key):
    fc_sizes, _ = compute_fc_sizes()
    keys = jax.random.split(key, 2 * (NUM_CONVS + NUM_FCS))
    ki = iter(keys)
    convs = []
    cin = 1
    for _ in range(NUM_CONVS):
        w = jax.random.normal(next(ki), (CONV_FEATURES, cin, FILTER_SIZE), jnp.float32) * 0.2
        b = jax.random.normal(next(ki), (CONV_FEATURES,), jnp.float32) * 0.1
        convs.append((w, b))
        cin = CONV_FEATURES
    fcs = []
    for i in range(NUM_FCS):
        w = jax.random.normal(next(ki), (fc_sizes[i + 1], fc_sizes[i]), jnp.float32) * 0.2
        b = jax.random.normal(next(ki), (fc_sizes[i + 1],), jnp.float32) * 0.1
        fcs.append((w, b))
    return {'convs': convs, 'fcs': fcs}, fc_sizes


def reference_forward(kmers, params):
    B = kmers.shape[0]
    h = kmers.astype(jnp.float32)[:, None, :]     # (B, 1, L)  NCW
    for w, b in params['convs']:                  # w: (Cout, Cin, K)
        Cout, Cin, K = w.shape
        L = h.shape[2]
        Lout = L - K + 1
        out = jnp.zeros((B, Cout, Lout), jnp.float32)
        for k in range(K):
            out = out + jnp.einsum('bcl,oc->bol', h[:, :, k:k + Lout], w[:, :, k])
        out = out + b[None, :, None]
        out = jnp.maximum(out, 0.0)
        pooled = (Lout - POOL_SIZE) // POOL_SIZE + 1
        out = out[:, :, :pooled * POOL_SIZE].reshape(B, Cout, pooled, POOL_SIZE).max(axis=3)
        h = out
    flat = h.reshape(B, -1)                       # channel-major flatten, like .view()
    for i, (w, b) in enumerate(params['fcs']):
        flat = flat @ w.T + b
        flat = jax.nn.sigmoid(flat) if i == len(params['fcs']) - 1 else jnp.maximum(flat, 0.0)
    return flat


if __name__ == "__main__":
    key = jax.random.PRNGKey(0)
    pkey, xkey = jax.random.split(key)
    params, fc_sizes = init_params(pkey)
    kmers = jax.random.uniform(xkey, (BATCH, IN_SIZE), jnp.float32)

    ref = reference_forward(kmers, params)

    # f32-operand variant: exact-math check against the reference.
    fwd_f32, pbuf = build_forward(params, op_dtype=jnp.float32)
    out_f32 = jax.block_until_ready(fwd_f32(kmers, pbuf))
    assert out_f32.shape == (BATCH, 1), out_f32.shape
    assert jnp.allclose(out_f32, ref, atol=1e-4, rtol=1e-4), (out_f32, ref)

    # bf16 MXU-operand variant (the perf-tuned default): looser tolerance.
    fwd_bf16, pbuf_bf16 = build_forward(params, op_dtype=jnp.bfloat16)
    out_bf16 = jax.block_until_ready(fwd_bf16(kmers, pbuf_bf16))
    assert out_bf16.shape == (BATCH, 1), out_bf16.shape
    assert jnp.allclose(out_bf16, ref, atol=2e-2, rtol=2e-2), (out_bf16, ref)

    print("KERNEL_OK")
</pallas_src>

<mosaic_0001>
module attributes {stable_mosaic.version = 11 : i64} {
  func.func @kmer_cnn_kernel(%arg0: i32, %arg1: memref<128x16xf32, #tpu.memory_space<vmem>>, %arg2: memref<152x256xf32, #tpu.memory_space<vmem>>, %arg3: memref<128x8xf32, #tpu.memory_space<vmem>>) attributes {dimension_semantics = [#tpu.dimension_semantics<parallel>], iteration_bounds = array<i64: 1>, scalar_prefetch = 0 : i64, scratch_operands = 0 : i64, tpu.core_type = #tpu.core_type<tc>, window_params = [{transform_indices = @transform_0, window_bounds = array<i64: 128, 16>}, {pipeline_mode = #tpu.pipeline_mode<synchronous>, transform_indices = @transform_1, window_bounds = array<i64: 152, 256>}, {transform_indices = @transform_2, window_bounds = array<i64: 128, 8>}]} {
    %c0 = arith.constant 0 : index
    %c0_0 = arith.constant 0 : index
    %0 = vector.load %arg1[%c0, %c0_0] : memref<128x16xf32, #tpu.memory_space<vmem>>, vector<128x16xf32>
    %c0_1 = arith.constant 0 : index
    %c0_2 = arith.constant 0 : index
    %1 = vector.load %arg2[%c0_1, %c0_2] : memref<152x256xf32, #tpu.memory_space<vmem>>, vector<16x256xf32>
    %cst = arith.constant dense<0.000000e+00> : vector<128x256xf32>
    %2 = tpu.matmul %0, %1, %cst {dimension_numbers = #tpu.dot_dimension_numbers<[1], [0], [0], [1], [0, 0, 1, 1], [], []>} : vector<128x16xf32>, vector<16x256xf32>, vector<128x256xf32> -> vector<128x256xf32>
    %c16 = arith.constant 16 : index
    %c0_3 = arith.constant 0 : index
    %3 = vector.load %arg2[%c16, %c0_3] : memref<152x256xf32, #tpu.memory_space<vmem>>, vector<1x128xf32>
    %4 = vector.extract_strided_slice %2 {offsets = [0, 0], sizes = [128, 128], strides = [1, 1]} : vector<128x256xf32> to vector<128x128xf32>
    %5 = vector.extract_strided_slice %2 {offsets = [0, 128], sizes = [128, 128], strides = [1, 1]} : vector<128x256xf32> to vector<128x128xf32>
    %6 = arith.maximumf %4, %5 : vector<128x128xf32>
    %7 = vector.broadcast %3 : vector<1x128xf32> to vector<128x128xf32>
    %8 = arith.addf %6, %7 : vector<128x128xf32>
    %cst_4 = arith.constant 0.000000e+00 : f32
    %9 = vector.broadcast %cst_4 : f32 to vector<128x128xf32>
    %10 = arith.maximumf %8, %9 : vector<128x128xf32>
    %c24 = arith.constant 24 : index
    %c0_5 = arith.constant 0 : index
    %11 = vector.load %arg2[%c24, %c0_5] : memref<152x256xf32, #tpu.memory_space<vmem>>, vector<56x256xf32>
    %12 = vector.extract_strided_slice %10 {offsets = [0, 0], sizes = [128, 56], strides = [1, 1]} : vector<128x128xf32> to vector<128x56xf32>
    %cst_6 = arith.constant dense<0.000000e+00> : vector<128x256xf32>
    %13 = tpu.matmul %12, %11, %cst_6 {dimension_numbers = #tpu.dot_dimension_numbers<[1], [0], [0], [1], [0, 0, 1, 1], [], []>} : vector<128x56xf32>, vector<56x256xf32>, vector<128x256xf32> -> vector<128x256xf32>
    %c80 = arith.constant 80 : index
    %c0_7 = arith.constant 0 : index
    %14 = vector.load %arg2[%c80, %c0_7] : memref<152x256xf32, #tpu.memory_space<vmem>>, vector<1x128xf32>
    %15 = vector.extract_strided_slice %13 {offsets = [0, 0], sizes = [128, 128], strides = [1, 1]} : vector<128x256xf32> to vector<128x128xf32>
    %16 = vector.extract_strided_slice %13 {offsets = [0, 128], sizes = [128, 128], strides = [1, 1]} : vector<128x256xf32> to vector<128x128xf32>
    %17 = arith.maximumf %15, %16 : vector<128x128xf32>
    %18 = vector.broadcast %14 : vector<1x128xf32> to vector<128x128xf32>
    %19 = arith.addf %17, %18 : vector<128x128xf32>
    %cst_8 = arith.constant 0.000000e+00 : f32
    %20 = vector.broadcast %cst_8 : f32 to vector<128x128xf32>
    %21 = arith.maximumf %19, %20 : vector<128x128xf32>
    %c88 = arith.constant 88 : index
    %c0_9 = arith.constant 0 : index
    %22 = vector.load %arg2[%c88, %c0_9] : memref<152x256xf32, #tpu.memory_space<vmem>>, vector<16x32xf32>
    %23 = vector.extract_strided_slice %21 {offsets = [0, 0], sizes = [128, 16], strides = [1, 1]} : vector<128x128xf32> to vector<128x16xf32>
    %cst_10 = arith.constant dense<0.000000e+00> : vector<128x32xf32>
    %24 = tpu.matmul %23, %22, %cst_10 {dimension_numbers = #tpu.dot_dimension_numbers<[1], [0], [0], [1], [0, 0, 1, 1], [], []>} : vector<128x16xf32>, vector<16x32xf32>, vector<128x32xf32> -> vector<128x32xf32>
    %c104 = arith.constant 104 : index
    %c0_11 = arith.constant 0 : index
    %25 = vector.load %arg2[%c104, %c0_11] : memref<152x256xf32, #tpu.memory_space<vmem>>, vector<1x32xf32>
    %26 = vector.broadcast %25 : vector<1x32xf32> to vector<128x32xf32>
    %27 = arith.addf %24, %26 : vector<128x32xf32>
    %cst_12 = arith.constant 0.000000e+00 : f32
    %28 = vector.broadcast %cst_12 : f32 to vector<128x32xf32>
    %29 = arith.maximumf %27, %28 : vector<128x32xf32>
    %c112 = arith.constant 112 : index
    %c0_13 = arith.constant 0 : index
    %30 = vector.load %arg2[%c112, %c0_13] : memref<152x256xf32, #tpu.memory_space<vmem>>, vector<32x8xf32>
    %cst_14 = arith.constant dense<0.000000e+00> : vector<128x8xf32>
    %31 = tpu.matmul %29, %30, %cst_14 {dimension_numbers = #tpu.dot_dimension_numbers<[1], [0], [0], [1], [0, 0, 1, 1], [], []>} : vector<128x32xf32>, vector<32x8xf32>, vector<128x8xf32> -> vector<128x8xf32>
    %c144 = arith.constant 144 : index
    %c0_15 = arith.constant 0 : index
    %32 = vector.load %arg2[%c144, %c0_15] : memref<152x256xf32, #tpu.memory_space<vmem>>, vector<1x8xf32>
    %33 = vector.broadcast %32 : vector<1x8xf32> to vector<128x8xf32>
    %34 = arith.addf %31, %33 : vector<128x8xf32>
    %35 = arith.negf %34 : vector<128x8xf32>
    %36 = math.exp %35 : vector<128x8xf32>
    %cst_16 = arith.constant 1.000000e+00 : f32
    %37 = vector.broadcast %cst_16 : f32 to vector<128x8xf32>
    %38 = arith.addf %37, %36 : vector<128x8xf32>
    %39 = arith.divf %37, %38 : vector<128x8xf32>
    %c0_17 = arith.constant 0 : index
    %c0_18 = arith.constant 0 : index
    %40 = vector.load %arg3[%c0_17, %c0_18] : memref<128x8xf32, #tpu.memory_space<vmem>>, vector<128x8xf32>
    tpu.vector_store %arg3[%c0_17, %c0_18], %39 {strides = array<i32>} : memref<128x8xf32, #tpu.memory_space<vmem>>, vector<128x8xf32>,
    return
  }
  func.func @transform_0(%arg0: i32) -> (i32, i32) {
    %c0_i32 = arith.constant 0 : i32
    %c0_i32_0 = arith.constant 0 : i32
    return %arg0, %c0_i32 : i32, i32
  }
  func.func @transform_1(%arg0: i32) -> (i32, i32) {
    %c0_i32 = arith.constant 0 : i32
    %c0_i32_0 = arith.constant 0 : i32
    %c0_i32_1 = arith.constant 0 : i32
    return %c0_i32, %c0_i32_0 : i32, i32
  }
  func.func @transform_2(%arg0: i32) -> (i32, i32) {
    %c0_i32 = arith.constant 0 : i32
    %c0_i32_0 = arith.constant 0 : i32
    return %arg0, %c0_i32 : i32, i32
  }
}

</mosaic_0001>

<bundles_post_ra>
// kernel: _forward_impl.1
= control target key start
LH: loop header
LB: loop body
LE: loop exit
PB: predicated region body
PF: predicated region fallthrough
CT: control target
= control target key end

     0   :  { %7 = vsyncpa [#allocation3], 0  ;;  %s1388_s9 = smov [#allocation2]   ;;  %s1672_s0 = inlined_call_operand.vmem [shape: f32[128,16], index: 0, kind: input, shape index: {}]   ;;  %s1673_s1 = inlined_call_operand.hbm [shape: f32[152,256], index: 1, kind: input, shape index: {}]   ;;  %s1674_s2 = inlined_call_operand.vmem [shape: f32[128,8], index: 2, kind: output, shape index: {}]  }
   0x1   :  { %s15_s10 = sshll.u32 %s1388_s9, 4  ;;  %s16_s10 = int_to_ptr.vmem [resolvable:$true] %s15_s10 }
   0x2   :  { %s1374_s11 = scalar_lea.vmem %s16_s10, 4864  ;;  %p1379_p1 = scmp.lt.s32.totalorder %s16_s10, %s16_s10 }
   0x3   :  { %p1375_p0 = scmp.ne.s32.totalorder %s16_s10, %s1374_s11  ;;  %p1380_p2 = scmp.lt.s32.totalorder %s1374_s11, %s1374_s11 }
   0x5   :  { %p1381_p3 = por %p1380_p2, %p1379_p1 }
   0x7   :  { %p1382_p4 = pnand %p1381_p3, %p1375_p0 }
   0x9   :  { %1385 = shalt.err (!%p1382_p4)
}
   0xa   :  { %s1389_s12 = smov 256   ;;  %s1390_s13 = smov 16  }
   0xb   :  { %21 = dma.hbm_to_vmem [thread:$0]  %s1673_s1, 4864, %s16_s10, [#allocation3], %s1389_s12, %s1389_s12, %s1390_s13  }
   0xc   :  { %1386 = dma.done.wait [#allocation3], 4864  }
   0xd   :  { %1387 = vsyncadd [#allocation3], 4294962432  ;;  %v1391_v0 = vmov 0.0   ;;  %v44_v1 = vld [vmem:[#allocation2 + $0x18] sm:$0xff]  ;;  %v43_v2 = vld [vmem:[#allocation2 + $0x10] sm:$0xff]  ;;  %vm45_vm0 = vcmask 130048  }
   0xe   :  { %158 = vmatprep.mubr.f32.mxu0 %v1391_v0  ;;  %437 = vmatprep.mubr.f32.mxu1 %v1391_v0  ;;  %v42_v3 = vld [vmem:[#allocation2 + $0x8] sm:$0xff]  ;;  %v41_v4 = vld [vmem:[#allocation2] sm:$0xff]  ;;  %v317_v7 = vld [vmem:[#allocation2 + $0x98] sm:$0xff]  ;;  %vm318_vm1 = vcmask 457728   ;;  %vm794_vm2 = vcmask 261120   ;;  %vm1084_vm3 = vcmask 64512  }
   0xf   :  { %122 = vmatprep.subr.mxu0 %v44_v1  ;;  %v25_v5 = vld [vmem:[%s1672_s0] sm:$0xff]  ;;  %v26_v6 = vld [vmem:[%s1672_s0 + $0x8] sm:$0xff]  ;;  %v316_v8 = vld [vmem:[#allocation2 + $0x90] sm:$0xff]  ;;  %1284 = vmatprep.subr.mxu1 %v317_v7 }
  0x10   :  { %123 = vmatpush1.msra.mxu0 %v43_v2  ;;  %v315_v9 = vld [vmem:[#allocation2 + $0x88] sm:$0xff]  ;;  %v314_v10 = vld [vmem:[#allocation2 + $0x80] sm:$0xff]  ;;  %v313_v11 = vld [vmem:[#allocation2 + $0x78] sm:$0xff]  ;;  %1291 = vmatpush1.msra.mxu1 %v316_v8 }
  0x11   :  { %124 = vmatprep.subr.mxu0 %v42_v3  ;;  %v312_v12 = vld [vmem:[#allocation2 + $0x70] sm:$0xff]  ;;  %1285 = vmatprep.subr.mxu1 %v315_v9  ;;  %v28_v14 = vld [vmem:[%s1672_s0 + $0x18] sm:$0xff]  ;;  %v29_v15 = vld [vmem:[%s1672_s0 + $0x20] sm:$0xff] }
  0x12   :  { %125 = vmatpush1.msra.mxu0 %v41_v4  ;;  %v27_v13 = vld [vmem:[%s1672_s0 + $0x10] sm:$0xff]  ;;  %1292 = vmatpush1.msra.mxu1 %v314_v10  ;;  %v30_v16 = vld [vmem:[%s1672_s0 + $0x28] sm:$0xff]  ;;  %v32_v18 = vld [vmem:[%s1672_s0 + $0x38] sm:$0xff] }
  0x13   :  { %1106 = vmatmul.mubr.msk.f32.vlgmr.msra.gmra.mxu0 %vm45_vm0, %v25_v5  ;;  %385 = vmatprep.subr.mxu0 %v317_v7  ;;  %v31_v17 = vld [vmem:[%s1672_s0 + $0x30] sm:$0xff]  ;;  %v33_v19 = vld [vmem:[%s1672_s0 + $0x40] sm:$0xff]  ;;  %v34_v20 = vld [vmem:[%s1672_s0 + $0x48] sm:$0xff] }
  0x14   :  { %164 = vmatprep.mubr.f32.mxu0 %v1391_v0  ;;  %386 = vmatpush1.msra.mxu0 %v316_v8  ;;  %v35_v21 = vld [vmem:[%s1672_s0 + $0x50] sm:$0xff]  ;;  %v36_v22 = vld [vmem:[%s1672_s0 + $0x58] sm:$0xff]  ;;  %v37_v23 = vld [vmem:[%s1672_s0 + $0x60] sm:$0xff] }
  0x15   :  { %387 = vmatprep.subr.mxu0 %v315_v9  ;;  %1286 = vmatprep.subr.mxu1 %v313_v11  ;;  %v38_v24 = vld [vmem:[%s1672_s0 + $0x68] sm:$0xff]  ;;  %v39_v25 = vld [vmem:[%s1672_s0 + $0x70] sm:$0xff]  ;;  %v40_v26 = vld [vmem:[%s1672_s0 + $0x78] sm:$0xff] }
  0x16   :  { %388 = vmatpush1.msra.mxu0 %v314_v10  ;;  %1293 = vmatpush1.msra.mxu1 %v312_v12  ;;  %v311_v27 = vld [vmem:[#allocation2 + $0x68] sm:$0xff]  ;;  %v310_v28 = vld [vmem:[#allocation2 + $0x60] sm:$0xff]  ;;  %v309_v29 = vld [vmem:[#allocation2 + $0x58] sm:$0xff] }
  0x17   :  { %1107 = vmatmul.mubr.msk.f32.gmra.mxu0 %vm45_vm0, %v26_v6  ;;  %389 = vmatprep.subr.mxu0 %v313_v11  ;;  %v308_v30 = vld [vmem:[#allocation2 + $0x50] sm:$0xff]  ;;  %v307_v31 = vld [vmem:[#allocation2 + $0x48] sm:$0xff]  ;;  %v306_v32 = vld [vmem:[#allocation2 + $0x40] sm:$0xff] }
  0x18   :  { %170 = vmatprep.mubr.f32.mxu0 %v1391_v0  ;;  %390 = vmatpush1.msra.mxu0 %v312_v12  ;;  %v305_v33 = vld [vmem:[#allocation2 + $0x38] sm:$0xff]  ;;  %v304_v34 = vld [vmem:[#allocation2 + $0x30] sm:$0xff]  ;;  %v1492_v37 = vld [vmem:[#allocation2 + $0x20] ss:$0 sm:$0xff] }
  0x19   :  { %391 = vmatprep.subr.mxu0 %v311_v27  ;;  %1287 = vmatprep.subr.mxu1 %v311_v27 }
  0x1a   :  { %392 = vmatpush1.msra.mxu0 %v310_v28  ;;  %1294 = vmatpush1.msra.mxu1 %v310_v28 }
  0x1b   :  { %1108 = vmatmul.mubr.msk.f32.gmra.mxu0 %vm45_vm0, %v27_v13  ;;  %393 = vmatprep.subr.mxu0 %v309_v29 }
  0x1c   :  { %176 = vmatprep.mubr.f32.mxu0 %v1391_v0  ;;  %1288 = vmatprep.subr.mxu1 %v309_v29 }
  0x1d   :  { %394 = vmatpush1.msra.mxu0 %v308_v30  ;;  %1295 = vmatpush1.msra.mxu1 %v308_v30 }
  0x1e   :  { %395 = vmatprep.subr.mxu0 %v307_v31  ;;  %1289 = vmatprep.subr.mxu1 %v307_v31 }
  0x1f   :  { %1109 = vmatmul.mubr.msk.f32.gmra.mxu0 %vm45_vm0, %v28_v14  ;;  %1296 = vmatpush1.msra.mxu1 %v306_v32 }
  0x20   :  { %182 = vmatprep.mubr.f32.mxu0 %v1391_v0  ;;  %396 = vmatpush1.msra.mxu0 %v306_v32 }
  0x21   :  { %397 = vmatprep.subr.mxu0 %v305_v33  ;;  %1290 = vmatprep.subr.mxu1 %v305_v33 }
  0x22   :  { %398 = vmatpush1.msra.mxu0 %v304_v34  ;;  %1297 = vmatpush1.msra.mxu1 %v304_v34 }
  0x23   :  { %1110 = vmatmul.mubr.msk.f32.gmra.mxu0 %vm45_vm0, %v29_v15 }
  0x24   :  { %188 = vmatprep.mubr.f32.mxu0 %v1391_v0 }
  0x27   :  { %1111 = vmatmul.mubr.msk.f32.gmra.mxu0 %vm45_vm0, %v30_v16 }
  0x28   :  { %194 = vmatprep.mubr.f32.mxu0 %v1391_v0 }
  0x2b   :  { %1112 = vmatmul.mubr.msk.f32.gmra.mxu0 %vm45_vm0, %v31_v17 }
  0x2c   :  { %200 = vmatprep.mubr.f32.mxu0 %v1391_v0 }
  0x2f   :  { %1113 = vmatmul.mubr.msk.f32.gmra.mxu0 %vm45_vm0, %v32_v18 }
  0x30   :  { %206 = vmatprep.mubr.f32.mxu0 %v1391_v0 }
  0x33   :  { %1114 = vmatmul.mubr.msk.f32.gmra.mxu0 %vm45_vm0, %v33_v19 }
  0x34   :  { %212 = vmatprep.mubr.f32.mxu0 %v1391_v0 }
  0x37   :  { %1115 = vmatmul.mubr.msk.f32.gmra.mxu0 %vm45_vm0, %v34_v20 }
  0x38   :  { %218 = vmatprep.mubr.f32.mxu0 %v1391_v0 }
  0x3b   :  { %1116 = vmatmul.mubr.msk.f32.gmra.mxu0 %vm45_vm0, %v35_v21 }
  0x3c   :  { %224 = vmatprep.mubr.f32.mxu0 %v1391_v0 }
  0x3f   :  { %1117 = vmatmul.mubr.msk.f32.gmra.mxu0 %vm45_vm0, %v36_v22 }
  0x40   :  { %230 = vmatprep.mubr.f32.mxu0 %v1391_v0 }
  0x43   :  { %1118 = vmatmul.mubr.msk.f32.gmra.mxu0 %vm45_vm0, %v37_v23 }
  0x44   :  { %236 = vmatprep.mubr.f32.mxu0 %v1391_v0 }
  0x47   :  { %1119 = vmatmul.mubr.msk.f32.gmra.mxu0 %vm45_vm0, %v38_v24 }
  0x48   :  { %242 = vmatprep.mubr.f32.mxu0 %v1391_v0 }
  0x4b   :  { %1120 = vmatmul.mubr.msk.f32.gmra.mxu0 %vm45_vm0, %v39_v25 }
  0x4c   :  { %248 = vmatprep.mubr.f32.mxu0 %v1391_v0 }
  0x4f   :  { %1121 = vmatmul.mubr.msk.f32.gmra.mxu0 %vm45_vm0, %v40_v26 }
  0x50   :  { %431 = vmatprep.mubr.f32.mxu0 %v1391_v0 }
  0xd3   :  { %v160_v35 = vpop.f32.mrf.mxu0 }
  0xd5   :  { %v162_v36 = vpop.f32.mrf.mxu0 }
  0xd6   :  { %v256_v38 = vmax.f32 %v160_v35, %v162_v36 }
  0xd7   :  { %v166_v39 = vpop.f32.mrf.mxu0 }
  0xd8   :  { %v272_v40 = vadd.f32 %v256_v38, %v1492_v37 }
  0xd9   :  { %v168_v41 = vpop.f32.mrf.mxu0 }
  0xda   :  { %v288_v42 = vmax.f32 %v272_v40, 0.0  ;;  %v257_v43 = vmax.f32 %v166_v39, %v168_v41 }
  0xdb   :  { %v172_v44 = vpop.f32.mrf.mxu0 }
  0xdc   :  { %v273_v45 = vadd.f32 %v257_v43, %v1492_v37  ;;  %1122 = vmatmul.mubr.msk.f32.vlgmr.msra.gmra.mxu0 %vm318_vm1, %v288_v42 }
  0xdd   :  { %v174_v46 = vpop.f32.mrf.mxu0 }
  0xde   :  { %v289_v47 = vmax.f32 %v273_v45, 0.0  ;;  %v258_v48 = vmax.f32 %v172_v44, %v174_v46 }
  0xdf   :  { %v178_v49 = vpop.f32.mrf.mxu0 }
  0xe0   :  { %v274_v50 = vadd.f32 %v258_v48, %v1492_v37  ;;  %1123 = vmatmul.mubr.msk.f32.vlgmr.msra.gmra.mxu1 %vm318_vm1, %v289_v47 }
  0xe1   :  { %v180_v51 = vpop.f32.mrf.mxu0  ;;  %443 = vmatprep.mubr.f32.mxu1 %v1391_v0 }
  0xe2   :  { %v290_v52 = vmax.f32 %v274_v50, 0.0  ;;  %v259_v53 = vmax.f32 %v178_v49, %v180_v51 }
  0xe3   :  { %v184_v54 = vpop.f32.mrf.mxu0 }
  0xe4   :  { %v275_v55 = vadd.f32 %v259_v53, %v1492_v37  ;;  %1124 = vmatmul.mubr.msk.f32.gmra.mxu1 %vm318_vm1, %v290_v52 }
  0xe5   :  { %v186_v56 = vpop.f32.mrf.mxu0  ;;  %449 = vmatprep.mubr.f32.mxu1 %v1391_v0 }
  0xe6   :  { %v291_v57 = vmax.f32 %v275_v55, 0.0  ;;  %v260_v58 = vmax.f32 %v184_v54, %v186_v56  ;;  %v578_v54 = vld [vmem:[#allocation2 + $0xc0] sm:$0xff]  ;;  %v577_v55 = vld [vmem:[#allocation2 + $0xb0] sm:$0xff] }
  0xe7   :  { %v190_v59 = vpop.f32.mrf.mxu0  ;;  %1224 = vmatprep.subr.mxu0 %v578_v54  ;;  %v792_v56 = vld [vmem:[#allocation2 + $0x110] sm:$0xff] }
  0xe8   :  { %v276_v60 = vadd.f32 %v260_v58, %v1492_v37  ;;  %1125 = vmatmul.mubr.msk.f32.gmra.mxu1 %vm318_vm1, %v291_v57  ;;  %1225 = vmatpush3.msra.mxu0 %v578_v54  ;;  %v791_v57 = vld [vmem:[#allocation2 + $0x100] sm:$0xff] }
  0xe9   :  { %v192_v61 = vpop.f32.mrf.mxu0  ;;  %455 = vmatprep.mubr.f32.mxu1 %v1391_v0  ;;  %1226 = vmatprep.subr.mxu0 %v577_v55 }
  0xea   :  { %v292_v62 = vmax.f32 %v276_v60, 0.0  ;;  %v261_v63 = vmax.f32 %v190_v59, %v192_v61  ;;  %1227 = vmatpush3.msra.mxu0 %v577_v55  ;;  %1252 = vmatprep.subr.mxu1 %v792_v56  ;;  %v1540_v59 = vld [vmem:[#allocation2 + $0xa0] ss:$0 sm:$0xff] }
  0xeb   :  { %v196_v1 = vpop.f32.mrf.mxu0  ;;  %1253 = vmatpush3.msra.mxu1 %v792_v56 }
  0xec   :  { %v277_v2 = vadd.f32 %v261_v63, %v1492_v37  ;;  %1126 = vmatmul.mubr.msk.f32.gmra.mxu1 %vm318_vm1, %v292_v62  ;;  %1254 = vmatprep.subr.mxu1 %v791_v57 }
  0xed   :  { %v198_v3 = vpop.f32.mrf.mxu0  ;;  %461 = vmatprep.mubr.f32.mxu1 %v1391_v0  ;;  %1255 = vmatpush3.msra.mxu1 %v791_v57 }
  0xee   :  { %v293_v4 = vmax.f32 %v277_v2, 0.0  ;;  %v262_v5 = vmax.f32 %v196_v1, %v198_v3 }
  0xef   :  { %v202_v6 = vpop.f32.mrf.mxu0 }
  0xf0   :  { %v278_v7 = vadd.f32 %v262_v5, %v1492_v37  ;;  %1127 = vmatmul.mubr.msk.f32.gmra.mxu1 %vm318_vm1, %v293_v4 }
  0xf1   :  { %v204_v8 = vpop.f32.mrf.mxu0  ;;  %467 = vmatprep.mubr.f32.mxu1 %v1391_v0 }
  0xf2   :  { %v294_v9 = vmax.f32 %v278_v7, 0.0  ;;  %v263_v10 = vmax.f32 %v202_v6, %v204_v8 }
  0xf3   :  { %v208_v11 = vpop.f32.mrf.mxu0 }
  0xf4   :  { %v279_v12 = vadd.f32 %v263_v10, %v1492_v37  ;;  %1128 = vmatmul.mubr.msk.f32.gmra.mxu1 %vm318_vm1, %v294_v9 }
  0xf5   :  { %v210_v13 = vpop.f32.mrf.mxu0  ;;  %473 = vmatprep.mubr.f32.mxu1 %v1391_v0 }
  0xf6   :  { %v295_v14 = vmax.f32 %v279_v12, 0.0  ;;  %v264_v15 = vmax.f32 %v208_v11, %v210_v13 }
  0xf7   :  { %v214_v16 = vpop.f32.mrf.mxu0 }
  0xf8   :  { %v280_v17 = vadd.f32 %v264_v15, %v1492_v37  ;;  %1129 = vmatmul.mubr.msk.f32.gmra.mxu1 %vm318_vm1, %v295_v14 }
  0xf9   :  { %v216_v18 = vpop.f32.mrf.mxu0  ;;  %479 = vmatprep.mubr.f32.mxu1 %v1391_v0 }
  0xfa   :  { %v296_v19 = vmax.f32 %v280_v17, 0.0  ;;  %v265_v20 = vmax.f32 %v214_v16, %v216_v18 }
  0xfb   :  { %v220_v21 = vpop.f32.mrf.mxu0 }
  0xfc   :  { %v281_v22 = vadd.f32 %v265_v20, %v1492_v37  ;;  %1130 = vmatmul.mubr.msk.f32.gmra.mxu1 %vm318_vm1, %v296_v19 }
  0xfd   :  { %v222_v23 = vpop.f32.mrf.mxu0  ;;  %485 = vmatprep.mubr.f32.mxu1 %v1391_v0 }
  0xfe   :  { %v297_v24 = vmax.f32 %v281_v22, 0.0  ;;  %v266_v25 = vmax.f32 %v220_v21, %v222_v23 }
  0xff   :  { %v226_v26 = vpop.f32.mrf.mxu0 }
 0x100   :  { %v282_v27 = vadd.f32 %v266_v25, %v1492_v37  ;;  %1131 = vmatmul.mubr.msk.f32.gmra.mxu1 %vm318_vm1, %v297_v24 }
 0x101   :  { %v228_v28 = vpop.f32.mrf.mxu0  ;;  %491 = vmatprep.mubr.f32.mxu1 %v1391_v0 }
 0x102   :  { %v298_v29 = vmax.f32 %v282_v27, 0.0  ;;  %v267_v30 = vmax.f32 %v226_v26, %v228_v28 }
 0x103   :  { %v232_v31 = vpop.f32.mrf.mxu0 }
 0x104   :  { %v283_v32 = vadd.f32 %v267_v30, %v1492_v37  ;;  %1132 = vmatmul.mubr.msk.f32.gmra.mxu1 %vm318_vm1, %v298_v29 }
 0x105   :  { %v234_v33 = vpop.f32.mrf.mxu0  ;;  %497 = vmatprep.mubr.f32.mxu1 %v1391_v0 }
 0x106   :  { %v299_v34 = vmax.f32 %v283_v32, 0.0  ;;  %v268_v35 = vmax.f32 %v232_v31, %v234_v33 }
 0x107   :  { %v238_v36 = vpop.f32.mrf.mxu0 }
 0x108   :  { %v284_v38 = vadd.f32 %v268_v35, %v1492_v37  ;;  %1133 = vmatmul.mubr.msk.f32.gmra.mxu1 %vm318_vm1, %v299_v34 }
 0x109   :  { %v240_v39 = vpop.f32.mrf.mxu0  ;;  %503 = vmatprep.mubr.f32.mxu1 %v1391_v0 }
 0x10a   :  { %v300_v40 = vmax.f32 %v284_v38, 0.0  ;;  %v269_v41 = vmax.f32 %v238_v36, %v240_v39 }
 0x10b   :  { %v244_v42 = vpop.f32.mrf.mxu0 }
 0x10c   :  { %v285_v43 = vadd.f32 %v269_v41, %v1492_v37  ;;  %1134 = vmatmul.mubr.msk.f32.gmra.mxu1 %vm318_vm1, %v300_v40 }
 0x10d   :  { %v246_v44 = vpop.f32.mrf.mxu0  ;;  %509 = vmatprep.mubr.f32.mxu1 %v1391_v0 }
 0x10e   :  { %v301_v45 = vmax.f32 %v285_v43, 0.0  ;;  %v270_v46 = vmax.f32 %v244_v42, %v246_v44 }
 0x10f   :  { %v250_v47 = vpop.f32.mrf.mxu0 }
 0x110   :  { %v286_v48 = vadd.f32 %v270_v46, %v1492_v37  ;;  %1135 = vmatmul.mubr.msk.f32.gmra.mxu1 %vm318_vm1, %v301_v45 }
 0x111   :  { %v252_v49 = vpop.f32.mrf.mxu0  ;;  %515 = vmatprep.mubr.f32.mxu1 %v1391_v0 }
 0x112   :  { %v302_v50 = vmax.f32 %v286_v48, 0.0  ;;  %v271_v51 = vmax.f32 %v250_v47, %v252_v49 }
 0x114   :  { %v287_v52 = vadd.f32 %v271_v51, %v1492_v37  ;;  %1136 = vmatmul.mubr.msk.f32.gmra.mxu1 %vm318_vm1, %v302_v50 }
 0x115   :  { %521 = vmatprep.mubr.f32.mxu1 %v1391_v0 }
 0x116   :  { %v303_v53 = vmax.f32 %v287_v52, 0.0 }
 0x118   :  { %1137 = vmatmul.mubr.msk.f32.gmra.mxu1 %vm318_vm1, %v303_v53 }
 0x19c   :  { %v433_v37 = vpop.f32.mrf.mxu0 }
 0x19e   :  { %v435_v58 = vpop.f32.mrf.mxu0 }
 0x19f   :  { %v529_v0 = vmax.f32 %v433_v37, %v435_v58 }
 0x1a0   :  { %v439_v60 = vpop.f32.mrf.mxu1 }
 0x1a1   :  { %v545_v61 = vadd.f32 %v529_v0, %v1540_v59 }
 0x1a2   :  { %v441_v62 = vpop.f32.mrf.mxu1 }
 0x1a3   :  { %v561_v63 = vmax.f32 %v545_v61, 0.0  ;;  %v530_v1 = vmax.f32 %v439_v60, %v441_v62 }
 0x1a4   :  { %v445_v2 = vpop.f32.mrf.mxu1 }
 0x1a5   :  { %v546_v3 = vadd.f32 %v530_v1, %v1540_v59  ;;  %1228 = vmatprep.mubr.msk.f32.mxu0 %vm45_vm0, %v561_v63 }
 0x1a6   :  { %v447_v4 = vpop.f32.mrf.mxu1 }
 0x1a7   :  { %v562_v5 = vmax.f32 %v546_v3, 0.0  ;;  %v531_v6 = vmax.f32 %v445_v2, %v447_v4 }
 0x1a8   :  { %v451_v7 = vpop.f32.mrf.mxu1 }
 0x1a9   :  { %v547_v8 = vadd.f32 %v531_v6, %v1540_v59  ;;  %1229 = vmatmul.mubr.msk.f32.vlgmr.msra.gmra.mxu0 %vm45_vm0, %v562_v5 }
 0x1aa   :  { %v453_v9 = vpop.f32.mrf.mxu1 }
 0x1ab   :  { %v563_v10 = vmax.f32 %v547_v8, 0.0  ;;  %v532_v11 = vmax.f32 %v451_v7, %v453_v9 }
 0x1ac   :  { %v457_v12 = vpop.f32.mrf.mxu1 }
 0x1ad   :  { %v548_v13 = vadd.f32 %v532_v11, %v1540_v59  ;;  %1231 = vmatprep.mubr.msk.f32.mxu0 %vm45_vm0, %v563_v10  ;;  %v790_v11 = vld [vmem:[#allocation2 + $0xf0] sm:$0xff] }
 0x1ae   :  { %v459_v14 = vpop.f32.mrf.mxu1  ;;  %1256 = vmatprep.subr.mxu1 %v790_v11 }
 0x1af   :  { %v564_v15 = vmax.f32 %v548_v13, 0.0  ;;  %v533_v16 = vmax.f32 %v457_v12, %v459_v14  ;;  %1257 = vmatpush3.msra.mxu1 %v790_v11  ;;  %v789_v12 = vld [vmem:[#allocation2 + $0xe0] sm:$0xff]  ;;  %v579_v13 = vld [vmem:[#allocation2 + $0xd0] ss:$0 sm:$0xff] }
 0x1b0   :  { %v463_v17 = vpop.f32.mrf.mxu1  ;;  %1258 = vmatprep.subr.mxu1 %v789_v12 }
 0x1b1   :  { %v549_v18 = vadd.f32 %v533_v16, %v1540_v59  ;;  %1232 = vmatmul.mubr.msk.f32.gmra.mxu0 %vm45_vm0, %v564_v15  ;;  %1259 = vmatpush3.msra.mxu1 %v789_v12 }
 0x1b2   :  { %v465_v19 = vpop.f32.mrf.mxu1 }
 0x1b3   :  { %v565_v20 = vmax.f32 %v549_v18, 0.0  ;;  %v534_v21 = vmax.f32 %v463_v17, %v465_v19 }
 0x1b4   :  { %v469_v22 = vpop.f32.mrf.mxu1 }
 0x1b5   :  { %v550_v23 = vadd.f32 %v534_v21, %v1540_v59  ;;  %1234 = vmatprep.mubr.msk.f32.mxu0 %vm45_vm0, %v565_v20 }
 0x1b6   :  { %v471_v24 = vpop.f32.mrf.mxu1 }
 0x1b7   :  { %v566_v25 = vmax.f32 %v550_v23, 0.0  ;;  %v535_v26 = vmax.f32 %v469_v22, %v471_v24 }
 0x1b8   :  { %v475_v27 = vpop.f32.mrf.mxu1 }
 0x1b9   :  { %v551_v28 = vadd.f32 %v535_v26, %v1540_v59  ;;  %1235 = vmatmul.mubr.msk.f32.gmra.mxu0 %vm45_vm0, %v566_v25 }
 0x1ba   :  { %v477_v29 = vpop.f32.mrf.mxu1 }
 0x1bb   :  { %v567_v30 = vmax.f32 %v551_v28, 0.0  ;;  %v536_v31 = vmax.f32 %v475_v27, %v477_v29 }
 0x1bc   :  { %v481_v32 = vpop.f32.mrf.mxu1 }
 0x1bd   :  { %v552_v33 = vadd.f32 %v536_v31, %v1540_v59  ;;  %1237 = vmatprep.mubr.msk.f32.mxu0 %vm45_vm0, %v567_v30 }
 0x1be   :  { %v483_v34 = vpop.f32.mrf.mxu1 }
 0x1bf   :  { %v568_v35 = vmax.f32 %v552_v33, 0.0  ;;  %v537_v36 = vmax.f32 %v481_v32, %v483_v34 }
 0x1c0   :  { %v487_v38 = vpop.f32.mrf.mxu1 }
 0x1c1   :  { %v553_v39 = vadd.f32 %v537_v36, %v1540_v59  ;;  %1238 = vmatmul.mubr.msk.f32.gmra.mxu0 %vm45_vm0, %v568_v35 }
 0x1c2   :  { %v489_v40 = vpop.f32.mrf.mxu1 }
 0x1c3   :  { %v569_v41 = vmax.f32 %v553_v39, 0.0  ;;  %v538_v42 = vmax.f32 %v487_v38, %v489_v40 }
 0x1c4   :  { %v493_v43 = vpop.f32.mrf.mxu1 }
 0x1c5   :  { %v554_v44 = vadd.f32 %v538_v42, %v1540_v59  ;;  %1240 = vmatprep.mubr.msk.f32.mxu0 %vm45_vm0, %v569_v41 }
 0x1c6   :  { %v495_v45 = vpop.f32.mrf.mxu1 }
 0x1c7   :  { %v570_v46 = vmax.f32 %v554_v44, 0.0  ;;  %v539_v47 = vmax.f32 %v493_v43, %v495_v45 }
 0x1c8   :  { %v499_v48 = vpop.f32.mrf.mxu1 }
 0x1c9   :  { %v555_v49 = vadd.f32 %v539_v47, %v1540_v59  ;;  %1241 = vmatmul.mubr.msk.f32.gmra.mxu0 %vm45_vm0, %v570_v46 }
 0x1ca   :  { %v501_v50 = vpop.f32.mrf.mxu1 }
 0x1cb   :  { %v571_v51 = vmax.f32 %v555_v49, 0.0  ;;  %v540_v52 = vmax.f32 %v499_v48, %v501_v50 }
 0x1cc   :  { %v505_v53 = vpop.f32.mrf.mxu1 }
 0x1cd   :  { %v556_v54 = vadd.f32 %v540_v52, %v1540_v59  ;;  %1243 = vmatprep.mubr.msk.f32.mxu0 %vm45_vm0, %v571_v51 }
 0x1ce   :  { %v507_v55 = vpop.f32.mrf.mxu1 }
 0x1cf   :  { %v572_v56 = vmax.f32 %v556_v54, 0.0  ;;  %v541_v57 = vmax.f32 %v505_v53, %v507_v55 }
 0x1d0   :  { %v511_v37 = vpop.f32.mrf.mxu1 }
 0x1d1   :  { %v557_v58 = vadd.f32 %v541_v57, %v1540_v59  ;;  %1244 = vmatmul.mubr.msk.f32.gmra.mxu0 %vm45_vm0, %v572_v56 }
 0x1d2   :  { %v513_v0 = vpop.f32.mrf.mxu1 }
 0x1d3   :  { %v573_v60 = vmax.f32 %v557_v58, 0.0  ;;  %v542_v61 = vmax.f32 %v511_v37, %v513_v0 }
 0x1d4   :  { %v517_v62 = vpop.f32.mrf.mxu1 }
 0x1d5   :  { %v558_v63 = vadd.f32 %v542_v61, %v1540_v59  ;;  %1246 = vmatprep.mubr.msk.f32.mxu0 %vm45_vm0, %v573_v60  ;;  %v1590_v61 = vld [vmem:[#allocation2 + $0x120] ss:$0 sm:$0xff] }
 0x1d6   :  { %v519_v1 = vpop.f32.mrf.mxu1 }
 0x1d7   :  { %v574_v2 = vmax.f32 %v558_v63, 0.0  ;;  %v543_v3 = vmax.f32 %v517_v62, %v519_v1 }
 0x1d8   :  { %v523_v4 = vpop.f32.mrf.mxu1 }
 0x1d9   :  { %v559_v5 = vadd.f32 %v543_v3, %v1540_v59  ;;  %1247 = vmatmul.mubr.msk.f32.gmra.mxu0 %vm45_vm0, %v574_v2 }
 0x1da   :  { %v525_v6 = vpop.f32.mrf.mxu1 }
 0x1db   :  { %v575_v7 = vmax.f32 %v559_v5, 0.0  ;;  %v544_v8 = vmax.f32 %v523_v4, %v525_v6 }
 0x1dd   :  { %v560_v9 = vadd.f32 %v544_v8, %v1540_v59  ;;  %1249 = vmatprep.mubr.msk.f32.mxu0 %vm45_vm0, %v575_v7 }
 0x1df   :  { %v576_v10 = vmax.f32 %v560_v9, 0.0 }
 0x1e1   :  { %1250 = vmatmul.mubr.msk.f32.gmra.mxu0 %vm45_vm0, %v576_v10 }
 0x269   :  { %v1230_v14 = vpop.f32.mrf.mxu0 }
 0x26a   :  { %v700_v15 = vadd.f32 %v1230_v14, %v579_v13 }
 0x26b   :  { %v694_v16 = vpop.f32.mrf.mxu0 }
 0x26c   :  { %v695_v17 = vadd.f32 %v694_v16, %v579_v13  ;;  %v774_v19 = vmax.f32 %v700_v15, 0.0 }
 0x26e   :  { %v773_v18 = vmax.f32 %v695_v17, 0.0 }
 0x270   :  { %1260 = vmatprep.mubr.msk.f32.mxu1 %vm794_vm2, %v773_v18 }
 0x271   :  { %v1233_v59 = vpop.f32.mrf.mxu0  ;;  %1261 = vmatmul.mubr.msk.f32.vlgmr.msra.gmra.mxu1 %vm794_vm2, %v774_v19 }
 0x272   :  { %v710_v20 = vadd.f32 %v1233_v59, %v579_v13 }
 0x273   :  { %v704_v21 = vpop.f32.mrf.mxu0 }
 0x274   :  { %v705_v22 = vadd.f32 %v704_v21, %v579_v13  ;;  %v776_v24 = vmax.f32 %v710_v20, 0.0 }
 0x276   :  { %v775_v23 = vmax.f32 %v705_v22, 0.0 }
 0x278   :  { %1263 = vmatprep.mubr.msk.f32.mxu1 %vm794_vm2, %v775_v23 }
 0x279   :  { %v1236_v25 = vpop.f32.mrf.mxu0  ;;  %1264 = vmatmul.mubr.msk.f32.gmra.mxu1 %vm794_vm2, %v776_v24 }
 0x27a   :  { %v720_v26 = vadd.f32 %v1236_v25, %v579_v13 }
 0x27b   :  { %v714_v27 = vpop.f32.mrf.mxu0 }
 0x27c   :  { %v715_v28 = vadd.f32 %v714_v27, %v579_v13  ;;  %v778_v30 = vmax.f32 %v720_v26, 0.0 }
 0x27e   :  { %v777_v29 = vmax.f32 %v715_v28, 0.0 }
 0x280   :  { %1266 = vmatprep.mubr.msk.f32.mxu1 %vm794_vm2, %v777_v29 }
 0x281   :  { %v1239_v31 = vpop.f32.mrf.mxu0  ;;  %1267 = vmatmul.mubr.msk.f32.gmra.mxu1 %vm794_vm2, %v778_v30 }
 0x282   :  { %v730_v32 = vadd.f32 %v1239_v31, %v579_v13 }
 0x283   :  { %v724_v33 = vpop.f32.mrf.mxu0 }
 0x284   :  { %v725_v34 = vadd.f32 %v724_v33, %v579_v13  ;;  %v780_v36 = vmax.f32 %v730_v32, 0.0 }
 0x286   :  { %v779_v35 = vmax.f32 %v725_v34, 0.0 }
 0x288   :  { %1269 = vmatprep.mubr.msk.f32.mxu1 %vm794_vm2, %v779_v35 }
 0x289   :  { %v1242_v38 = vpop.f32.mrf.mxu0  ;;  %1270 = vmatmul.mubr.msk.f32.gmra.mxu1 %vm794_vm2, %v780_v36 }
 0x28a   :  { %v740_v39 = vadd.f32 %v1242_v38, %v579_v13 }
 0x28b   :  { %v734_v40 = vpop.f32.mrf.mxu0 }
 0x28c   :  { %v735_v41 = vadd.f32 %v734_v40, %v579_v13  ;;  %v782_v43 = vmax.f32 %v740_v39, 0.0 }
 0x28e   :  { %v781_v42 = vmax.f32 %v735_v41, 0.0 }
 0x290   :  { %1272 = vmatprep.mubr.msk.f32.mxu1 %vm794_vm2, %v781_v42 }
 0x291   :  { %v1245_v44 = vpop.f32.mrf.mxu0  ;;  %1273 = vmatmul.mubr.msk.f32.gmra.mxu1 %vm794_vm2, %v782_v43 }
 0x292   :  { %v750_v45 = vadd.f32 %v1245_v44, %v579_v13 }
 0x293   :  { %v744_v46 = vpop.f32.mrf.mxu0 }
 0x294   :  { %v745_v47 = vadd.f32 %v744_v46, %v579_v13  ;;  %v784_v49 = vmax.f32 %v750_v45, 0.0 }
 0x296   :  { %v783_v48 = vmax.f32 %v745_v47, 0.0 }
 0x298   :  { %1275 = vmatprep.mubr.msk.f32.mxu1 %vm794_vm2, %v783_v48 }
 0x299   :  { %v1248_v50 = vpop.f32.mrf.mxu0  ;;  %1276 = vmatmul.mubr.msk.f32.gmra.mxu1 %vm794_vm2, %v784_v49 }
 0x29a   :  { %v760_v51 = vadd.f32 %v1248_v50, %v579_v13 }
 0x29b   :  { %v754_v52 = vpop.f32.mrf.mxu0 }
 0x29c   :  { %v755_v53 = vadd.f32 %v754_v52, %v579_v13  ;;  %v786_v55 = vmax.f32 %v760_v51, 0.0 }
 0x29e   :  { %v785_v54 = vmax.f32 %v755_v53, 0.0 }
 0x2a0   :  { %1278 = vmatprep.mubr.msk.f32.mxu1 %vm794_vm2, %v785_v54 }
 0x2a1   :  { %v1251_v56 = vpop.f32.mrf.mxu0  ;;  %1279 = vmatmul.mubr.msk.f32.gmra.mxu1 %vm794_vm2, %v786_v55 }
 0x2a2   :  { %v770_v57 = vadd.f32 %v1251_v56, %v579_v13 }
 0x2a3   :  { %v764_v37 = vpop.f32.mrf.mxu0 }
 0x2a4   :  { %v765_v58 = vadd.f32 %v764_v37, %v579_v13  ;;  %v788_v60 = vmax.f32 %v770_v57, 0.0 }
 0x2a6   :  { %v787_v0 = vmax.f32 %v765_v58, 0.0 }
 0x2a8   :  { %1281 = vmatprep.mubr.msk.f32.mxu1 %vm794_vm2, %v787_v0 }
 0x2a9   :  { %1282 = vmatmul.mubr.msk.f32.gmra.mxu1 %vm794_vm2, %v788_v60 }
 0x331   :  { %v1262_v62 = vpop.f32.mrf.mxu1 }
 0x332   :  { %v915_v63 = vadd.f32 %v1262_v62, %v1590_v61 }
 0x333   :  { %v909_v1 = vpop.f32.mrf.mxu1 }
 0x334   :  { %v1171_v2 = vmul.f32 -1.442695, %v915_v63  ;;  %v910_v3 = vadd.f32 %v909_v1, %v1590_v61 }
 0x336   :  { %1302 = vpow2.f32 %v1171_v2  ;;  %v1170_v4 = vmul.f32 -1.442695, %v910_v3 }
 0x338   :  { %1304 = vpow2.f32 %v1170_v4 }
 0x339   :  { %v1265_v5 = vpop.f32.mrf.mxu1 }
 0x33a   :  { %v925_v6 = vadd.f32 %v1265_v5, %v1590_v61 }
 0x33b   :  { %v919_v7 = vpop.f32.mrf.mxu1 }
 0x33c   :  { %v1173_v8 = vmul.f32 -1.442695, %v925_v6  ;;  %v920_v9 = vadd.f32 %v919_v7, %v1590_v61 }
 0x33e   :  { %1306 = vpow2.f32 %v1173_v8  ;;  %v1172_v10 = vmul.f32 -1.442695, %v920_v9 }
 0x340   :  { %1308 = vpow2.f32 %v1172_v10 }
 0x341   :  { %v1268_v11 = vpop.f32.mrf.mxu1 }
 0x342   :  { %v935_v12 = vadd.f32 %v1268_v11, %v1590_v61 }
 0x343   :  { %v1303_v13 = vpop.eup %1302  ;;  %v929_v14 = vpop.f32.mrf.mxu1 }
 0x344   :  { %v1037_v15 = vadd.f32 1.0, %v1303_v13  ;;  %v1175_v16 = vmul.f32 -1.442695, %v935_v12  ;;  %v930_v17 = vadd.f32 %v929_v14, %v1590_v61 }
 0x345   :  { %v1305_v18 = vpop.eup %1304 }
 0x346   :  { %1310 = vrcp.f32 %v1037_v15  ;;  %v1036_v19 = vadd.f32 1.0, %v1305_v18  ;;  %v1174_v59 = vmul.f32 -1.442695, %v930_v17 }
 0x347   :  { %1312 = vpow2.f32 %v1175_v16 }
 0x348   :  { %1314 = vrcp.f32 %v1036_v19 }
 0x349   :  { %1316 = vpow2.f32 %v1174_v59  ;;  %v1271_v20 = vpop.f32.mrf.mxu1 }
 0x34a   :  { %v945_v21 = vadd.f32 %v1271_v20, %v1590_v61 }
 0x34b   :  { %v1307_v22 = vpop.eup %1306  ;;  %v939_v23 = vpop.f32.mrf.mxu1 }
 0x34c   :  { %v1039_v24 = vadd.f32 1.0, %v1307_v22  ;;  %v1177_v25 = vmul.f32 -1.442695, %v945_v21  ;;  %v940_v26 = vadd.f32 %v939_v23, %v1590_v61 }
 0x34d   :  { %v1309_v27 = vpop.eup %1308 }
 0x34e   :  { %1318 = vrcp.f32 %v1039_v24  ;;  %v1038_v28 = vadd.f32 1.0, %v1309_v27  ;;  %v1176_v29 = vmul.f32 -1.442695, %v940_v26 }
 0x34f   :  { %1320 = vpow2.f32 %v1177_v25 }
 0x350   :  { %1322 = vrcp.f32 %v1038_v28 }
 0x351   :  { %1324 = vpow2.f32 %v1176_v29  ;;  %v1274_v30 = vpop.f32.mrf.mxu1 }
 0x352   :  { %v955_v31 = vadd.f32 %v1274_v30, %v1590_v61 }
 0x353   :  { %v1311_v32 = vpop.eup %1310  ;;  %v949_v33 = vpop.f32.mrf.mxu1 }
 0x354   :  { %v1313_v34 = vpop.eup %1312  ;;  %1086 = vst.msk [vmem:[%s1674_s2 + $0x8] sm:$0xff] %vm1084_vm3, %v1311_v32  ;;  %v1179_v35 = vmul.f32 -1.442695, %v955_v31  ;;  %v950_v36 = vadd.f32 %v949_v33, %v1590_v61 }
 0x355   :  { %v1315_v38 = vpop.eup %1314  ;;  %v1041_v39 = vadd.f32 1.0, %v1313_v34 }
 0x356   :  { %v1317_v40 = vpop.eup %1316  ;;  %1085 = vst.msk [vmem:[%s1674_s2] sm:$0xff] %vm1084_vm3, %v1315_v38  ;;  %1326 = vpow2.f32 %v1179_v35  ;;  %v1178_v41 = vmul.f32 -1.442695, %v950_v36 }
 0x357   :  { %1328 = vrcp.f32 %v1041_v39  ;;  %v1040_v42 = vadd.f32 1.0, %v1317_v40 }
 0x358   :  { %1330 = vpow2.f32 %v1178_v41 }
 0x359   :  { %1332 = vrcp.f32 %v1040_v42  ;;  %v1277_v43 = vpop.f32.mrf.mxu1 }
 0x35a   :  { %v965_v44 = vadd.f32 %v1277_v43, %v1590_v61 }
 0x35b   :  { %v1319_v45 = vpop.eup %1318  ;;  %v959_v46 = vpop.f32.mrf.mxu1 }
 0x35c   :  { %v1321_v47 = vpop.eup %1320  ;;  %1088 = vst.msk [vmem:[%s1674_s2 + $0x18] sm:$0xff] %vm1084_vm3, %v1319_v45  ;;  %v1181_v48 = vmul.f32 -1.442695, %v965_v44  ;;  %v960_v49 = vadd.f32 %v959_v46, %v1590_v61 }
 0x35d   :  { %v1323_v50 = vpop.eup %1322  ;;  %v1043_v51 = vadd.f32 1.0, %v1321_v47 }
 0x35e   :  { %v1325_v52 = vpop.eup %1324  ;;  %1087 = vst.msk [vmem:[%s1674_s2 + $0x10] sm:$0xff] %vm1084_vm3, %v1323_v50  ;;  %1334 = vpow2.f32 %v1181_v48  ;;  %v1180_v53 = vmul.f32 -1.442695, %v960_v49 }
 0x35f   :  { %1336 = vrcp.f32 %v1043_v51  ;;  %v1042_v54 = vadd.f32 1.0, %v1325_v52 }
 0x360   :  { %1338 = vpow2.f32 %v1180_v53 }
 0x361   :  { %1340 = vrcp.f32 %v1042_v54  ;;  %v1280_v55 = vpop.f32.mrf.mxu1 }
 0x362   :  { %v975_v56 = vadd.f32 %v1280_v55, %v1590_v61 }
 0x363   :  { %v1327_v57 = vpop.eup %1326  ;;  %v969_v37 = vpop.f32.mrf.mxu1 }
 0x364   :  { %v1329_v58 = vpop.eup %1328  ;;  %v1045_v0 = vadd.f32 1.0, %v1327_v57  ;;  %v1183_v60 = vmul.f32 -1.442695, %v975_v56  ;;  %v970_v62 = vadd.f32 %v969_v37, %v1590_v61 }
 0x365   :  { %v1331_v63 = vpop.eup %1330  ;;  %1090 = vst.msk [vmem:[%s1674_s2 + $0x28] sm:$0xff] %vm1084_vm3, %v1329_v58 }
 0x366   :  { %v1333_v1 = vpop.eup %1332  ;;  %1342 = vrcp.f32 %v1045_v0  ;;  %v1044_v2 = vadd.f32 1.0, %v1331_v63  ;;  %v1182_v3 = vmul.f32 -1.442695, %v970_v62 }
 0x367   :  { %1089 = vst.msk [vmem:[%s1674_s2 + $0x20] sm:$0xff] %vm1084_vm3, %v1333_v1  ;;  %1344 = vpow2.f32 %v1183_v60 }
 0x368   :  { %1346 = vrcp.f32 %v1044_v2 }
 0x369   :  { %1348 = vpow2.f32 %v1182_v3  ;;  %v1283_v4 = vpop.f32.mrf.mxu1 }
 0x36a   :  { %v985_v5 = vadd.f32 %v1283_v4, %v1590_v61 }
 0x36b   :  { %v1335_v6 = vpop.eup %1334  ;;  %v979_v7 = vpop.f32.mrf.mxu1 }
 0x36c   :  { %v1337_v8 = vpop.eup %1336  ;;  %v1047_v9 = vadd.f32 1.0, %v1335_v6  ;;  %v1185_v10 = vmul.f32 -1.442695, %v985_v5  ;;  %v980_v11 = vadd.f32 %v979_v7, %v1590_v61 }
 0x36d   :  { %v1339_v12 = vpop.eup %1338  ;;  %1092 = vst.msk [vmem:[%s1674_s2 + $0x38] sm:$0xff] %vm1084_vm3, %v1337_v8 }
 0x36e   :  { %v1341_v13 = vpop.eup %1340  ;;  %1350 = vrcp.f32 %v1047_v9  ;;  %v1046_v14 = vadd.f32 1.0, %v1339_v12  ;;  %v1184_v15 = vmul.f32 -1.442695, %v980_v11 }
 0x36f   :  { %1091 = vst.msk [vmem:[%s1674_s2 + $0x30] sm:$0xff] %vm1084_vm3, %v1341_v13  ;;  %1352 = vpow2.f32 %v1185_v10 }
 0x370   :  { %1354 = vrcp.f32 %v1046_v14 }
 0x371   :  { %1356 = vpow2.f32 %v1184_v15 }
 0x373   :  { %v1343_v16 = vpop.eup %1342 }
 0x374   :  { %v1345_v61 = vpop.eup %1344  ;;  %1094 = vst.msk [vmem:[%s1674_s2 + $0x48] sm:$0xff] %vm1084_vm3, %v1343_v16 }
 0x375   :  { %v1347_v17 = vpop.eup %1346  ;;  %v1049_v18 = vadd.f32 1.0, %v1345_v61 }
 0x376   :  { %v1349_v19 = vpop.eup %1348  ;;  %1093 = vst.msk [vmem:[%s1674_s2 + $0x40] sm:$0xff] %vm1084_vm3, %v1347_v17 }
 0x377   :  { %1358 = vrcp.f32 %v1049_v18  ;;  %v1048_v59 = vadd.f32 1.0, %v1349_v19 }
 0x379   :  { %1360 = vrcp.f32 %v1048_v59 }
 0x37b   :  { %v1351_v20 = vpop.eup %1350 }
 0x37c   :  { %v1353_v21 = vpop.eup %1352  ;;  %1096 = vst.msk [vmem:[%s1674_s2 + $0x58] sm:$0xff] %vm1084_vm3, %v1351_v20 }
 0x37d   :  { %v1355_v22 = vpop.eup %1354  ;;  %v1051_v23 = vadd.f32 1.0, %v1353_v21 }
 0x37e   :  { %v1357_v24 = vpop.eup %1356  ;;  %1095 = vst.msk [vmem:[%s1674_s2 + $0x50] sm:$0xff] %vm1084_vm3, %v1355_v22 }
 0x37f   :  { %1362 = vrcp.f32 %v1051_v23  ;;  %v1050_v25 = vadd.f32 1.0, %v1357_v24 }
 0x381   :  { %1364 = vrcp.f32 %v1050_v25 }
 0x384   :  { %v1359_v26 = vpop.eup %1358 }
 0x385   :  { %1098 = vst.msk [vmem:[%s1674_s2 + $0x68] sm:$0xff] %vm1084_vm3, %v1359_v26 }
 0x386   :  { %v1361_v27 = vpop.eup %1360 }
 0x387   :  { %1097 = vst.msk [vmem:[%s1674_s2 + $0x60] sm:$0xff] %vm1084_vm3, %v1361_v27 }
 0x38c   :  { %v1363_v28 = vpop.eup %1362 }
 0x38d   :  { %1100 = vst.msk [vmem:[%s1674_s2 + $0x78] sm:$0xff] %vm1084_vm3, %v1363_v28 }
 0x38e   :  { %v1365_v29 = vpop.eup %1364 }
 0x38f   :  { %1099 = vst.msk [vmem:[%s1674_s2 + $0x70] sm:$0xff] %vm1084_vm3, %v1365_v29 }
 0x390   :  { %1105 = vsyncpa [#allocation3], 1 }

</bundles_post_ra>
